<compile_context>
chip_gen: v7x
topology: tpu7x:2x2x1
jax: 0.10.0
libtpu: 0.0.40
codegen_flags: <defaults>
</compile_context>

<pallas_src>
import functools

import jax
import jax.numpy as jnp
from jax.experimental import pallas as pl
from jax.experimental.pallas import tpu as pltpu


# ---------------------------------------------------------------------------
# Kernel
# ---------------------------------------------------------------------------

def _fused_attention_kernel(x_ref, wqkv_ref, wout_ref, bout_ref, o_ref, *,
                            bb, heads, dim_head, mxu_dtype):
    inner = heads * dim_head
    N = x_ref.shape[1]
    dim = x_ref.shape[2]

    def mx(t):
        # Cast MXU *operands* only (weights are already pre-cast host-side);
        # accumulation and all softmax math stay f32.
        return t if mxu_dtype is None else t.astype(mxu_dtype)

    # --- qkv projection over the whole folded batch block: (bb*N, dim) @ (dim, 3*inner)
    x2 = x_ref[...].reshape(bb * N, dim)
    qkv = jnp.dot(mx(x2), wqkv_ref[...],
                  preferred_element_type=jnp.float32)            # (bb*N, 3*inner) f32
    qkv = qkv.reshape(bb, N, 3 * inner)

    # --- gather per-(batch, head) q/k/v as a leading batch axis: (bb*heads, N, Dh).
    # Heads are contiguous Dh-wide lane slices of qkv; stacking them along a NEW
    # leading axis needs no lane<->sublane relayout (unlike reshape+transpose).
    def heads_of(col0):
        return jnp.stack(
            [qkv[b, :, col0 + h * dim_head: col0 + (h + 1) * dim_head]
             for b in range(bb) for h in range(heads)], axis=0)

    q = heads_of(0)            # 1/sqrt(Dh) already folded into Wqkv's q columns
    k = heads_of(inner)
    v = heads_of(2 * inner)

    # --- one batched score matmul + ONE softmax across all (batch, head) pairs.
    # 'gqd,gkd->gqk' contracts the Dh axes directly (no explicit k transpose).
    dots = jnp.einsum('gqd,gkd->gqk', mx(q), mx(k),
                      preferred_element_type=jnp.float32)        # (bb*heads, N, N)

    m = jnp.max(dots, axis=-1, keepdims=True)                    # f32 softmax
    e = jnp.exp(dots - m)
    attn = e * pl.reciprocal(jnp.sum(e, axis=-1, keepdims=True), approx=True)

    out = jnp.einsum('gqk,gkd->gqd', mx(attn), mx(v),
                     preferred_element_type=jnp.float32)         # (bb*heads, N, Dh)

    # --- output projection accumulated per head (block decomposition of out @ Wout):
    # replaces the lane-concat of head outputs with a few tiny MXU matmuls.
    bias = bout_ref[...].astype(jnp.float32)                     # (1, dim)
    rows = []
    for b in range(bb):
        acc = jnp.zeros((N, dim), jnp.float32)
        for h in range(heads):
            w_h = wout_ref[h * dim_head:(h + 1) * dim_head, :]   # (Dh, dim)
            acc = acc + jnp.dot(mx(out[b * heads + h]), w_h,
                                preferred_element_type=jnp.float32)
        rows.append(acc + bias)                                  # bias added once
    y = jnp.stack(rows, axis=0)                                  # (bb, N, dim)
    o_ref[...] = y.astype(o_ref.dtype)


# ---------------------------------------------------------------------------
# Parameter prep (one-time, NOT per-call work)
# ---------------------------------------------------------------------------

def prepare_attention_params(raw, *, heads, dim_head, mxu_dtype=None):
    """One-time parameter preparation:
      * fold the 1/sqrt(Dh) attention scale into the q columns of w_qkv,
      * optionally pre-cast the matmul weights to the MXU operand dtype
        (bf16 is the right default on v6e/v7x; keep None/f32 on v5e or when
        exactness vs an f32 reference matters).
    Weights are stored transposed (in_features, out_features) so the kernel
    computes x @ W directly (== torch's x @ W.T)."""
    inner = heads * dim_head
    scale = float(dim_head) ** -0.5
    w_qkv = raw["w_qkv"].astype(jnp.float32)
    w_qkv = w_qkv.at[:, :inner].multiply(scale)
    w_out = raw["w_out"].astype(jnp.float32)
    if mxu_dtype is not None:
        w_qkv = w_qkv.astype(mxu_dtype)
        w_out = w_out.astype(mxu_dtype)
    return {
        "w_qkv": w_qkv,                                   # (dim, 3*inner)
        "w_out": w_out,                                   # (inner, dim)
        "b_out": raw["b_out"].reshape(1, -1).astype(jnp.float32),  # (1, dim)
        "mxu_dtype": mxu_dtype,                           # static config, not an array
    }


# ---------------------------------------------------------------------------
# Wrapper
# ---------------------------------------------------------------------------

def attention_forward(x, params, *, heads, dim_head):
    B, N, dim = x.shape
    inner = heads * dim_head
    mxu_dtype = params.get("mxu_dtype", None)

    # At most 2 grid steps (fold the batch), kept 2-wide and "parallel" so both of
    # v7x's TensorCores are fed; v5e/v6e just see <= 2 pipelined steps.
    G = 2 if (B >= 2 and B % 2 == 0) else 1
    bb = B // G

    kernel = functools.partial(_fused_attention_kernel, bb=bb, heads=heads,
                               dim_head=dim_head, mxu_dtype=mxu_dtype)

    return pl.pallas_call(
        kernel,
        out_shape=jax.ShapeDtypeStruct((B, N, dim), x.dtype),
        grid=(G,),
        in_specs=[
            pl.BlockSpec((bb, N, dim), lambda g: (g, 0, 0)),
            # constant index_maps -> weights stay VMEM-resident across the grid
            pl.BlockSpec((dim, 3 * inner), lambda g: (0, 0)),
            pl.BlockSpec((inner, dim), lambda g: (0, 0)),
            pl.BlockSpec((1, dim), lambda g: (0, 0)),
        ],
        out_specs=pl.BlockSpec((bb, N, dim), lambda g: (g, 0, 0)),
        compiler_params=pltpu.CompilerParams(
            dimension_semantics=("parallel",)),
    )(x, params["w_qkv"], params["w_out"], params["b_out"])


# pure-JAX reference (mirrors the PyTorch module) for a sanity check
def attention_reference(x, raw, *, heads, dim_head):
    B, N, dim = x.shape
    inner = heads * dim_head
    scale = float(dim_head) ** -0.5
    qkv = x @ raw["w_qkv"]
    q, k, v = jnp.split(qkv, 3, axis=-1)
    rs = lambda t: t.reshape(B, N, heads, dim_head).transpose(0, 2, 1, 3)
    q, k, v = rs(q), rs(k), rs(v)
    dots = jnp.einsum("bhqd,bhkd->bhqk", q, k) * scale
    attn = jax.nn.softmax(dots, axis=-1)
    out = jnp.einsum("bhqk,bhkd->bhqd", attn, v)
    out = out.transpose(0, 2, 1, 3).reshape(B, N, inner)
    return out @ raw["w_out"] + raw["b_out"]


# ---------------------------------------------------------------------------
# Main
# ---------------------------------------------------------------------------

if __name__ == "__main__":
    # small shapes consistent with the module
    B, N, DIM = 2, 8, 32
    HEADS, DIM_HEAD = 4, 16
    INNER = HEADS * DIM_HEAD

    key = jax.random.PRNGKey(0)
    kx, k1, k2, k3 = jax.random.split(key, 4)

    x = jax.random.normal(kx, (B, N, DIM), dtype=jnp.float32)

    # deterministic nn.Linear-shaped params (stored transposed for x @ W)
    lim_qkv = 1.0 / (DIM ** 0.5)
    lim_out = 1.0 / (INNER ** 0.5)
    raw_params = {
        "w_qkv": jax.random.uniform(k1, (DIM, 3 * INNER), jnp.float32,
                                    -lim_qkv, lim_qkv),
        "w_out": jax.random.uniform(k2, (INNER, DIM), jnp.float32,
                                    -lim_out, lim_out),
        "b_out": jax.random.uniform(k3, (DIM,), jnp.float32,
                                    -lim_out, lim_out),
    }

    y_ref = attention_reference(x, raw_params, heads=HEADS, dim_head=DIM_HEAD)

    # exact f32-MXU-operand path (default; the right choice on v5e)
    params_f32 = prepare_attention_params(raw_params, heads=HEADS, dim_head=DIM_HEAD)
    y = jax.block_until_ready(
        attention_forward(x, params_f32, heads=HEADS, dim_head=DIM_HEAD))
    assert y.shape == (B, N, DIM)
    # tolerance covers the EUP approx-reciprocal in the softmax denominator
    assert jnp.allclose(y, y_ref, atol=5e-3, rtol=5e-3), "f32 path mismatch vs reference"

    # bf16-MXU-operand path (default on v6e/v7x for larger N/dim); softmax stays f32,
    # accumulation stays f32, so only operand rounding (~bf16 eps) enters.
    params_bf16 = prepare_attention_params(raw_params, heads=HEADS, dim_head=DIM_HEAD,
                                           mxu_dtype=jnp.bfloat16)
    y_bf16 = jax.block_until_ready(
        attention_forward(x, params_bf16, heads=HEADS, dim_head=DIM_HEAD))
    assert jnp.allclose(y_bf16, y_ref, atol=5e-2, rtol=5e-2), \
        "bf16 path mismatch vs reference"

    print("KERNEL_OK")
</pallas_src>

<mosaic_0001>
module attributes {stable_mosaic.version = 11 : i64} {
  func.func @_fused_attention_kernel(%arg0: i32, %arg1: memref<1x8x32xf32, #tpu.memory_space<vmem>>, %arg2: memref<32x192xf32, #tpu.memory_space<vmem>>, %arg3: memref<64x32xf32, #tpu.memory_space<vmem>>, %arg4: memref<1x32xf32, #tpu.memory_space<vmem>>, %arg5: memref<1x8x32xf32, #tpu.memory_space<vmem>>) attributes {dimension_semantics = [#tpu.dimension_semantics<parallel>], iteration_bounds = array<i64: 2>, scalar_prefetch = 0 : i64, scratch_operands = 0 : i64, tpu.core_type = #tpu.core_type<tc>, window_params = [{transform_indices = @transform_0, window_bounds = array<i64: 1, 8, 32>}, {pipeline_mode = #tpu.pipeline_mode<synchronous>, transform_indices = @transform_1, window_bounds = array<i64: 32, 192>}, {pipeline_mode = #tpu.pipeline_mode<synchronous>, transform_indices = @transform_2, window_bounds = array<i64: 64, 32>}, {pipeline_mode = #tpu.pipeline_mode<synchronous>, transform_indices = @transform_3, window_bounds = array<i64: 1, 32>}, {transform_indices = @transform_4, window_bounds = array<i64: 1, 8, 32>}]} {
    %c0 = arith.constant 0 : index
    %c0_0 = arith.constant 0 : index
    %c0_1 = arith.constant 0 : index
    %0 = vector.load %arg1[%c0, %c0_0, %c0_1] : memref<1x8x32xf32, #tpu.memory_space<vmem>>, vector<1x8x32xf32>
    %1 = vector.shape_cast %0 : vector<1x8x32xf32> to vector<8x32xf32>
    %c0_2 = arith.constant 0 : index
    %c0_3 = arith.constant 0 : index
    %2 = vector.load %arg2[%c0_2, %c0_3] : memref<32x192xf32, #tpu.memory_space<vmem>>, vector<32x192xf32>
    %cst = arith.constant dense<0.000000e+00> : vector<8x192xf32>
    %3 = tpu.matmul %1, %2, %cst {dimension_numbers = #tpu.dot_dimension_numbers<[1], [0], [0], [1], [0, 0, 1, 1], [], []>} : vector<8x32xf32>, vector<32x192xf32>, vector<8x192xf32> -> vector<8x192xf32>
    %4 = vector.shape_cast %3 : vector<8x192xf32> to vector<1x8x192xf32>
    %5 = vector.extract_strided_slice %4 {offsets = [0, 0, 0], sizes = [1, 8, 16], strides = [1, 1, 1]} : vector<1x8x192xf32> to vector<1x8x16xf32>
    %6 = vector.shape_cast %5 : vector<1x8x16xf32> to vector<8x16xf32>
    %7 = vector.extract_strided_slice %4 {offsets = [0, 0, 16], sizes = [1, 8, 16], strides = [1, 1, 1]} : vector<1x8x192xf32> to vector<1x8x16xf32>
    %8 = vector.shape_cast %7 : vector<1x8x16xf32> to vector<8x16xf32>
    %9 = vector.extract_strided_slice %4 {offsets = [0, 0, 32], sizes = [1, 8, 16], strides = [1, 1, 1]} : vector<1x8x192xf32> to vector<1x8x16xf32>
    %10 = vector.shape_cast %9 : vector<1x8x16xf32> to vector<8x16xf32>
    %11 = vector.extract_strided_slice %4 {offsets = [0, 0, 48], sizes = [1, 8, 16], strides = [1, 1, 1]} : vector<1x8x192xf32> to vector<1x8x16xf32>
    %12 = vector.shape_cast %11 : vector<1x8x16xf32> to vector<8x16xf32>
    %13 = vector.shape_cast %6 : vector<8x16xf32> to vector<1x8x16xf32>
    %14 = vector.shape_cast %8 : vector<8x16xf32> to vector<1x8x16xf32>
    %15 = vector.shape_cast %10 : vector<8x16xf32> to vector<1x8x16xf32>
    %16 = vector.shape_cast %12 : vector<8x16xf32> to vector<1x8x16xf32>
    %17 = tpu.concatenate %13, %14, %15, %16 in 0 : vector<1x8x16xf32>, vector<1x8x16xf32>, vector<1x8x16xf32>, vector<1x8x16xf32> -> vector<4x8x16xf32>
    %18 = vector.extract_strided_slice %4 {offsets = [0, 0, 64], sizes = [1, 8, 16], strides = [1, 1, 1]} : vector<1x8x192xf32> to vector<1x8x16xf32>
    %19 = vector.shape_cast %18 : vector<1x8x16xf32> to vector<8x16xf32>
    %20 = vector.extract_strided_slice %4 {offsets = [0, 0, 80], sizes = [1, 8, 16], strides = [1, 1, 1]} : vector<1x8x192xf32> to vector<1x8x16xf32>
    %21 = vector.shape_cast %20 : vector<1x8x16xf32> to vector<8x16xf32>
    %22 = vector.extract_strided_slice %4 {offsets = [0, 0, 96], sizes = [1, 8, 16], strides = [1, 1, 1]} : vector<1x8x192xf32> to vector<1x8x16xf32>
    %23 = vector.shape_cast %22 : vector<1x8x16xf32> to vector<8x16xf32>
    %24 = vector.extract_strided_slice %4 {offsets = [0, 0, 112], sizes = [1, 8, 16], strides = [1, 1, 1]} : vector<1x8x192xf32> to vector<1x8x16xf32>
    %25 = vector.shape_cast %24 : vector<1x8x16xf32> to vector<8x16xf32>
    %26 = vector.shape_cast %19 : vector<8x16xf32> to vector<1x8x16xf32>
    %27 = vector.shape_cast %21 : vector<8x16xf32> to vector<1x8x16xf32>
    %28 = vector.shape_cast %23 : vector<8x16xf32> to vector<1x8x16xf32>
    %29 = vector.shape_cast %25 : vector<8x16xf32> to vector<1x8x16xf32>
    %30 = tpu.concatenate %26, %27, %28, %29 in 0 : vector<1x8x16xf32>, vector<1x8x16xf32>, vector<1x8x16xf32>, vector<1x8x16xf32> -> vector<4x8x16xf32>
    %31 = vector.extract_strided_slice %4 {offsets = [0, 0, 128], sizes = [1, 8, 16], strides = [1, 1, 1]} : vector<1x8x192xf32> to vector<1x8x16xf32>
    %32 = vector.shape_cast %31 : vector<1x8x16xf32> to vector<8x16xf32>
    %33 = vector.extract_strided_slice %4 {offsets = [0, 0, 144], sizes = [1, 8, 16], strides = [1, 1, 1]} : vector<1x8x192xf32> to vector<1x8x16xf32>
    %34 = vector.shape_cast %33 : vector<1x8x16xf32> to vector<8x16xf32>
    %35 = vector.extract_strided_slice %4 {offsets = [0, 0, 160], sizes = [1, 8, 16], strides = [1, 1, 1]} : vector<1x8x192xf32> to vector<1x8x16xf32>
    %36 = vector.shape_cast %35 : vector<1x8x16xf32> to vector<8x16xf32>
    %37 = vector.extract_strided_slice %4 {offsets = [0, 0, 176], sizes = [1, 8, 16], strides = [1, 1, 1]} : vector<1x8x192xf32> to vector<1x8x16xf32>
    %38 = vector.shape_cast %37 : vector<1x8x16xf32> to vector<8x16xf32>
    %39 = vector.shape_cast %32 : vector<8x16xf32> to vector<1x8x16xf32>
    %40 = vector.shape_cast %34 : vector<8x16xf32> to vector<1x8x16xf32>
    %41 = vector.shape_cast %36 : vector<8x16xf32> to vector<1x8x16xf32>
    %42 = vector.shape_cast %38 : vector<8x16xf32> to vector<1x8x16xf32>
    %43 = tpu.concatenate %39, %40, %41, %42 in 0 : vector<1x8x16xf32>, vector<1x8x16xf32>, vector<1x8x16xf32>, vector<1x8x16xf32> -> vector<4x8x16xf32>
    "tpu.trace_start"() <{level = 10 : i32, message = "gqd,gkd->gqk"}> : () -> ()
    %cst_4 = arith.constant dense<0.000000e+00> : vector<4x8x8xf32>
    %44 = tpu.matmul %17, %30, %cst_4 {dimension_numbers = #tpu.dot_dimension_numbers<[2], [2], [1], [1], [0, 0, 0, 1, 1, 1], [0], [0]>} : vector<4x8x16xf32>, vector<4x8x16xf32>, vector<4x8x8xf32> -> vector<4x8x8xf32>
    "tpu.trace_stop"() : () -> ()
    %cst_5 = arith.constant dense<0xFF800000> : vector<4x8xf32>
    %45 = vector.multi_reduction <maximumf>, %44, %cst_5 [2] : vector<4x8x8xf32> to vector<4x8xf32>
    %46 = vector.shape_cast %45 : vector<4x8xf32> to vector<4x8x1xf32>
    %47 = vector.broadcast %46 : vector<4x8x1xf32> to vector<4x8x8xf32>
    %48 = arith.subf %44, %47 : vector<4x8x8xf32>
    %49 = math.exp %48 : vector<4x8x8xf32>
    %cst_6 = arith.constant dense<0.000000e+00> : vector<4x8xf32>
    %50 = vector.multi_reduction <add>, %49, %cst_6 [2] : vector<4x8x8xf32> to vector<4x8xf32>
    %51 = vector.shape_cast %50 : vector<4x8xf32> to vector<4x8x1xf32>
    %52 = tpu.reciprocal %51 {approx = true} : vector<4x8x1xf32> -> vector<4x8x1xf32>
    %53 = vector.broadcast %52 : vector<4x8x1xf32> to vector<4x8x8xf32>
    %54 = arith.mulf %49, %53 : vector<4x8x8xf32>
    "tpu.trace_start"() <{level = 10 : i32, message = "gqk,gkd->gqd"}> : () -> ()
    %cst_7 = arith.constant dense<0.000000e+00> : vector<4x8x16xf32>
    %55 = tpu.matmul %54, %43, %cst_7 {dimension_numbers = #tpu.dot_dimension_numbers<[2], [1], [1], [2], [0, 0, 0, 1, 1, 2], [0], [0]>} : vector<4x8x8xf32>, vector<4x8x16xf32>, vector<4x8x16xf32> -> vector<4x8x16xf32>
    "tpu.trace_stop"() : () -> ()
    %c0_8 = arith.constant 0 : index
    %c0_9 = arith.constant 0 : index
    %56 = vector.load %arg4[%c0_8, %c0_9] : memref<1x32xf32, #tpu.memory_space<vmem>>, vector<1x32xf32>
    %cst_10 = arith.constant 0.000000e+00 : f32
    %57 = vector.broadcast %cst_10 : f32 to vector<8x32xf32>
    %c0_11 = arith.constant 0 : index
    %c0_12 = arith.constant 0 : index
    %58 = vector.load %arg3[%c0_11, %c0_12] : memref<64x32xf32, #tpu.memory_space<vmem>>, vector<16x32xf32>
    %59 = vector.extract_strided_slice %55 {offsets = [0, 0, 0], sizes = [1, 8, 16], strides = [1, 1, 1]} : vector<4x8x16xf32> to vector<1x8x16xf32>
    %60 = vector.shape_cast %59 : vector<1x8x16xf32> to vector<8x16xf32>
    %cst_13 = arith.constant dense<0.000000e+00> : vector<8x32xf32>
    %61 = tpu.matmul %60, %58, %cst_13 {dimension_numbers = #tpu.dot_dimension_numbers<[1], [0], [0], [1], [0, 0, 1, 1], [], []>} : vector<8x16xf32>, vector<16x32xf32>, vector<8x32xf32> -> vector<8x32xf32>
    %62 = arith.addf %57, %61 : vector<8x32xf32>
    %c16 = arith.constant 16 : index
    %c0_14 = arith.constant 0 : index
    %63 = vector.load %arg3[%c16, %c0_14] : memref<64x32xf32, #tpu.memory_space<vmem>>, vector<16x32xf32>
    %64 = vector.extract_strided_slice %55 {offsets = [1, 0, 0], sizes = [1, 8, 16], strides = [1, 1, 1]} : vector<4x8x16xf32> to vector<1x8x16xf32>
    %65 = vector.shape_cast %64 : vector<1x8x16xf32> to vector<8x16xf32>
    %cst_15 = arith.constant dense<0.000000e+00> : vector<8x32xf32>
    %66 = tpu.matmul %65, %63, %cst_15 {dimension_numbers = #tpu.dot_dimension_numbers<[1], [0], [0], [1], [0, 0, 1, 1], [], []>} : vector<8x16xf32>, vector<16x32xf32>, vector<8x32xf32> -> vector<8x32xf32>
    %67 = arith.addf %62, %66 : vector<8x32xf32>
    %c32 = arith.constant 32 : index
    %c0_16 = arith.constant 0 : index
    %68 = vector.load %arg3[%c32, %c0_16] : memref<64x32xf32, #tpu.memory_space<vmem>>, vector<16x32xf32>
    %69 = vector.extract_strided_slice %55 {offsets = [2, 0, 0], sizes = [1, 8, 16], strides = [1, 1, 1]} : vector<4x8x16xf32> to vector<1x8x16xf32>
    %70 = vector.shape_cast %69 : vector<1x8x16xf32> to vector<8x16xf32>
    %cst_17 = arith.constant dense<0.000000e+00> : vector<8x32xf32>
    %71 = tpu.matmul %70, %68, %cst_17 {dimension_numbers = #tpu.dot_dimension_numbers<[1], [0], [0], [1], [0, 0, 1, 1], [], []>} : vector<8x16xf32>, vector<16x32xf32>, vector<8x32xf32> -> vector<8x32xf32>
    %72 = arith.addf %67, %71 : vector<8x32xf32>
    %c48 = arith.constant 48 : index
    %c0_18 = arith.constant 0 : index
    %73 = vector.load %arg3[%c48, %c0_18] : memref<64x32xf32, #tpu.memory_space<vmem>>, vector<16x32xf32>
    %74 = vector.extract_strided_slice %55 {offsets = [3, 0, 0], sizes = [1, 8, 16], strides = [1, 1, 1]} : vector<4x8x16xf32> to vector<1x8x16xf32>
    %75 = vector.shape_cast %74 : vector<1x8x16xf32> to vector<8x16xf32>
    %cst_19 = arith.constant dense<0.000000e+00> : vector<8x32xf32>
    %76 = tpu.matmul %75, %73, %cst_19 {dimension_numbers = #tpu.dot_dimension_numbers<[1], [0], [0], [1], [0, 0, 1, 1], [], []>} : vector<8x16xf32>, vector<16x32xf32>, vector<8x32xf32> -> vector<8x32xf32>
    %77 = arith.addf %72, %76 : vector<8x32xf32>
    %78 = vector.broadcast %56 : vector<1x32xf32> to vector<8x32xf32>
    %79 = arith.addf %77, %78 : vector<8x32xf32>
    %80 = vector.shape_cast %79 : vector<8x32xf32> to vector<1x8x32xf32>
    %c0_20 = arith.constant 0 : index
    %c0_21 = arith.constant 0 : index
    %c0_22 = arith.constant 0 : index
    %81 = vector.load %arg5[%c0_20, %c0_21, %c0_22] : memref<1x8x32xf32, #tpu.memory_space<vmem>>, vector<1x8x32xf32>
    tpu.vector_store %arg5[%c0_20, %c0_21, %c0_22], %80 {strides = array<i32>} : memref<1x8x32xf32, #tpu.memory_space<vmem>>, vector<1x8x32xf32>,
    return
  }
  func.func @transform_0(%arg0: i32) -> (i32, i32, i32) {
    %c0_i32 = arith.constant 0 : i32
    %c0_i32_0 = arith.constant 0 : i32
    %c0_i32_1 = arith.constant 0 : i32
    return %arg0, %c0_i32, %c0_i32_0 : i32, i32, i32
  }
  func.func @transform_1(%arg0: i32) -> (i32, i32) {
    %c0_i32 = arith.constant 0 : i32
    %c0_i32_0 = arith.constant 0 : i32
    %c0_i32_1 = arith.constant 0 : i32
    return %c0_i32, %c0_i32_0 : i32, i32
  }
  func.func @transform_2(%arg0: i32) -> (i32, i32) {
    %c0_i32 = arith.constant 0 : i32
    %c0_i32_0 = arith.constant 0 : i32
    %c0_i32_1 = arith.constant 0 : i32
    return %c0_i32, %c0_i32_0 : i32, i32
  }
  func.func @transform_3(%arg0: i32) -> (i32, i32) {
    %c0_i32 = arith.constant 0 : i32
    %c0_i32_0 = arith.constant 0 : i32
    %c0_i32_1 = arith.constant 0 : i32
    return %c0_i32, %c0_i32_0 : i32, i32
  }
  func.func @transform_4(%arg0: i32) -> (i32, i32, i32) {
    %c0_i32 = arith.constant 0 : i32
    %c0_i32_0 = arith.constant 0 : i32
    %c0_i32_1 = arith.constant 0 : i32
    return %arg0, %c0_i32, %c0_i32_0 : i32, i32, i32
  }
}

</mosaic_0001>

<bundles_post_ra>
// kernel: tpu_custom_call.1
= control target key start
LH: loop header
LB: loop body
LE: loop exit
PB: predicated region body
PF: predicated region fallthrough
CT: control target
= control target key end

     0   :  { %9 = vsyncpa [#allocation3], 0  ;;  %s1845_s0 = inlined_call_operand.vmem [shape: f32[2,8,32], index: 0, kind: input, shape index: {}]   ;;  %s1846_s1 = inlined_call_operand.vmem [shape: f32[32,192], index: 1, kind: input, shape index: {}]   ;;  %s1847_s2 = inlined_call_operand.vmem [shape: f32[64,32], index: 2, kind: input, shape index: {}]   ;;  %s1848_s3 = inlined_call_operand.vmem [shape: f32[1,32], index: 3, kind: input, shape index: {}]   ;;  %s1849_s4 = inlined_call_operand.hbm [shape: f32[2,8,32], index: 4, kind: output, shape index: {}]  }
   0x1   :  { %11 = vsyncpa [#allocation3 + $0x1], 0  ;;  %s1623_s15 = smov 0   ;;  %s1625_s16 = smov 0  }
   0x2   :  { %s1627_s17 = smov 0   ;;  %s1629_s18 = smov 0  }
   0x3 LB: > { %s1644_s19 = sadd.s32 4294967295, %s1588_s18   ;;  %s1320_s20 = sadd.s32 4294967294, %s1588_s18   ;;  %s1588_s18 = sphi %s1629_s18, %s1855_s18   ;;  %s1584_s17 = sphi %s1627_s17, %s1854_s17   ;;  %s1580_s16 = sphi %s1625_s16, %s1853_s16   ;;  %s1576_s15 = sphi %s1623_s15, %s1852_s15  }
   0x4   : > { %s1648_s21 = sadd.s32 1, %s1588_s18   ;;  %s113_s22 = sadd.s32 1, %s1584_s17 }
   0x5   : > { %s110_s23 = ssub.s32 %s1588_s18, %s1648_s21  ;;  %p123_p0 = scmp.ne.s32.totalorder %s1584_s17, %s1580_s16 }
   0x6   : > { %p111_p1 = scmp.eq.s32.totalorder %s110_s23, 0  ;;  %p124_p2 = scmp.eq.s32.totalorder %s1644_s19, 1 }
   0x7   : > { %p129_p3 = scmp.ne.s32.totalorder %s1580_s16, %s1576_s15  ;;  %p130_p4 = scmp.eq.s32.totalorder %s1320_s20, 1 }
   0x8   : > { %s1659_s24 = scalar_select %p111_p1, %s1584_s17, %s113_s22  }
   0x9   : > { %p1661_p5 = por %p124_p2, %p123_p0  ;;  %p1665_p6 = por %p130_p4, %p129_p3 }
   0xa   : > { %p1323_p7 = scmp.ge.s32.totalorder %s1588_s18, 1  ;;  %p164_p8 = scmp.lt.s32.totalorder %s1588_s18, 3 }
   0xc   : > { %p165_p9 = pnand %p1323_p7, %p164_p8 }
   0xd   : > { %v195_v0 = vld [vmem:[%s1846_s1 + $0x8] sm:$0xff] (!%p165_p9)  ;;  %v197_v1 = vld [vmem:[%s1846_s1 + $0x18] sm:$0xff] (!%p165_p9)  ;;  %v194_v2 = vld [vmem:[%s1846_s1] sm:$0xff] (!%p165_p9)  ;;  %p189_p10 = scmp.lt.s32.totalorder (!%p165_p9), %s1644_s19, 1  ;;  %v1590_v7 = vmov (!%p165_p9), 0.0   ;;  %vm202_vm0 = vcmask (!%p165_p9), 261120  }
   0xe   : > { %168 = sbr.rel (%p165_p9) target bundleno = 1492 (0x5d4), region = 36  ;;  %v1444_v3 = vpack.c.bf16 (!%p165_p9), %v197_v1, %v195_v0  ;;  %v196_v4 = vld [vmem:[%s1846_s1 + $0x10] sm:$0xff] (!%p165_p9)  ;;  %v199_v5 = vld [vmem:[%s1846_s1 + $0x28] sm:$0xff] (!%p165_p9)  ;;  %v201_v6 = vld [vmem:[%s1846_s1 + $0x38] sm:$0xff] (!%p165_p9)  ;;  %270 = vmatprep.mubr.f32.mxu0 (!%p165_p9), %v1590_v7  ;;  %1376 = vmatprep.subr.mxu1 (!%p165_p9), %v1590_v7  ;;  %vm1591_vm1 = vmmov (!%p165_p9), 0   ;;  %s1592_s5 = smov (!%p165_p9), 80  }
   0xf   : > { %v1446_v8 = vpack.c.bf16 (!%p165_p9), %v196_v4, %v194_v2  ;;  %v1448_v9 = vpack.c.bf16 (!%p165_p9), %v201_v6, %v199_v5  ;;  %v198_v10 = vld [vmem:[%s1846_s1 + $0x20] sm:$0xff] (!%p165_p9)  ;;  %v200_v11 = vld [vmem:[%s1846_s1 + $0x30] sm:$0xff] (!%p165_p9)  ;;  %1378 = vmatprep.mubr.msk.f32.mxu1 (!%p165_p9), %vm1591_vm1, %v1590_v7  ;;  %s1593_s6 = smov (!%p165_p9), 112   ;;  %s1594_s7 = smov (!%p165_p9), 64   ;;  %vm296_vm2 = vcmask (!%p165_p9), 130048   ;;  %vm599_vm3 = vcmask (!%p165_p9), 64512  }
  0x10   : > { %1445 = vmatprep.subr.bf16.mxu0 (!%p165_p9), %v1444_v3  ;;  %v1450_v12 = vpack.c.bf16 (!%p165_p9), %v200_v11, %v198_v10  ;;  %s1595_s8 = smov (!%p165_p9), 96   ;;  %v1596_v61 = vmov (!%p165_p9), 0.0|0.0   ;;  %v939_v1 = vld [vmem:[%s1847_s2 + $0x10] sm:$0xff] (!%p165_p9)  ;;  %v940_v2 = vld [vmem:[%s1847_s2 + $0x18] sm:$0xff] (!%p165_p9)  ;;  %v938_v10 = vld [vmem:[%s1847_s2 + $0x8] sm:$0xff] (!%p165_p9)  ;;  %s1345_s12 = sshll.u32 (!%p165_p9), %s1644_s19, 7 }
  0x11   : > { %1447 = vmatpush1.bf16.msra.mxu0 (!%p165_p9), %v1446_v8  ;;  %v1453_v4 = vpack.c.bf16 (!%p165_p9), %v940_v2, %v939_v1 }
  0x12   : > { %1449 = vmatprep.subr.bf16.mxu0 (!%p165_p9), %v1448_v9  ;;  %v937_v9 = vld [vmem:[%s1847_s2] sm:$0xff] (!%p165_p9) }
  0x15   : > { %s190_s23 = scalar_select %p189_p10, %s1644_s19, 1  ;;  %1451 = vmatpush1.bf16.msra.mxu0 %v1450_v12  ;;  %v1456_v12 = vpack.c.bf16 %v938_v10, %v937_v9 }
  0x16   : > { %1386 = vmatprep.subr.mxu0 %v1590_v7  ;;  %s1597_s19 = smov [#allocation2]  }
  0x17   : > { %s1325_s27 = sshll.u32 %s190_s23, 3  ;;  %s1802_s23 = scalar_lea.hbm %s1849_s4, %s1345_s12 }
  0x18   : > { %s192_s30 = scalar_lea.vmem %s1845_s0, %s1325_s27  ;;  %s1530_s29 = sshll.u32 %s1597_s19, 4  ;;  %s1531_s29 = int_to_ptr.vmem [resolvable:$false] %s1530_s29 }
  0x19   : > { %v193_v13 = vld [vmem:[%s192_s30] sm:$0xff]  ;;  %s1532_s30 = scalar_lea.vmem %s1531_s29, 256 }
  0x1a   : > { %1326 = vmatmul.mubr.msk.f32.vlgmr.msra.gmra.mrb[0].mxu0 %vm202_vm0, %v193_v13 }
  0x1b   : > { %1388 = vmatprep.mubr.msk.f32.mxu0 %vm1591_vm1, %v1590_v7 }
  0xed   : > { %v272_v14 = vpop.f32.mrb[0].mxu0 }
  0xee   : > { %282 = vrot.lane.b32.xlu1 %v272_v14, %s1592_s5  ;;  %278 = vrot.lane.b32.xlu0 %v272_v14, %s1593_s6  ;;  %v1710_v15 = vpop.f32.mrb[1].mxu0 }
  0xf2   : > { %294 = vrot.lane.b32.xlu1 %v272_v14, %s1594_s7  ;;  %280 = vrot.lane.b32.xlu0 %v272_v14, %s1595_s8 }
 0x160   : > { %v283_v16 = vpop.permute.xlu1 %282  ;;  %v279_v17 = vpop.permute.xlu0 %278 }
 0x161   : > { %371 = vrot.lane.b32.xlu0 %v279_v17, %s1594_s7 }
 0x164   : > { %v295_v18 = vpop.permute.xlu1 %294  ;;  %v281_v19 = vpop.permute.xlu0 %280 }
 0x165   : > { %1377 = vmatpush3.xpose.msk.msra.mxu1 %vm296_vm2, %v295_v18  ;;  %523 = vrot.lane.b32.xlu0 %v283_v16, %s1594_s7 }
 0x166   : > { %447 = vrot.lane.b32.xlu1 %v281_v19, %s1594_s7  ;;  %1381 = vmatprep.subr.mxu1 %v1590_v7 }
 0x168   : > { %1379 = vmatmul.mubr.msk.f32.vlgmr.msra.gmra.mrb[0].mxu1 %vm296_vm2, %v272_v14  ;;  %v1163_v14 = vld [vmem:[%s1847_s2 + $0x30] sm:$0xff] }
 0x169   : > { %1383 = vmatprep.mubr.msk.f32.mxu1 %vm1591_vm1, %v1590_v7 }
 0x1d3   : > { %v372_v20 = vpop.permute.xlu0 %371 }
 0x1d4   : > { %1382 = vmatpush3.xpose.msk.msra.mxu1 %vm296_vm2, %v372_v20  ;;  %v1088_v20 = vld [vmem:[%s1847_s2 + $0x28] sm:$0xff] }
 0x1d5   : > { %1391 = vmatprep.subr.mxu1 %v1590_v7 }
 0x1d7   : > { %1384 = vmatmul.mubr.msk.f32.vlgmr.msra.gmra.mrb[2].mxu1 %vm296_vm2, %v279_v17  ;;  %v524_v21 = vpop.permute.xlu0 %523 }
 0x1d8   : > { %v448_v22 = vpop.permute.xlu1 %447  ;;  %1392 = vmatpush3.xpose.msk.msra.mxu1 %vm296_vm2, %v524_v21  ;;  %1393 = vmatprep.mubr.msk.f32.mxu1 %vm1591_vm1, %v1590_v7 }
 0x1d9   : > { %1387 = vmatpush3.xpose.msk.msra.mxu0 %vm296_vm2, %v448_v22  ;;  %1401 = vmatprep.subr.mxu1 %v1590_v7 }
 0x1da   : > { %1396 = vmatprep.subr.mxu0 %v1590_v7 }
 0x1db   : > { %1394 = vmatmul.mubr.msk.f32.vlgmr.msra.gmra.mrb[4].mxu1 %vm296_vm2, %v283_v16 }
 0x1dc   : > { %1389 = vmatmul.mubr.msk.f32.vlgmr.msra.gmra.mrb[2].mxu0 %vm296_vm2, %v281_v19  ;;  %1403 = vmatprep.mubr.msk.f32.mxu1 %vm1591_vm1, %v1590_v7  ;;  %v1087_v19 = vld [vmem:[%s1847_s2 + $0x20] sm:$0xff] }
 0x1dd   : > { %1397 = vmatpush3.msra.mxu0 %v1710_v15  ;;  %1398 = vmatprep.mubr.msk.f32.mxu0 %vm1591_vm1, %v1590_v7  ;;  %v1459_v21 = vpack.c.bf16 %v1088_v20, %v1087_v19 }
 0x1de   : > { %1406 = vmatprep.subr.mxu0 %v1590_v7 }
 0x23b   : > { %v367_v23 = vpop.f32.mrb[0].mxu1 }
 0x23c   : > { %v1380_v24 = vpop.f32.mrb[1].mxu1  ;;  %v600_v25 = vsel %vm599_vm3, %v367_v23, -inf }
 0x23d   : > { %601 = vmax.xlane.f32.xlu1 %v600_v25 }
 0x2aa   : > { %v443_v26 = vpop.f32.mrb[2].mxu1 }
 0x2ab   : > { %v1385_v27 = vpop.f32.mrb[3].mxu1  ;;  %v603_v28 = vsel %vm599_vm3, %v443_v26, -inf }
 0x2ac   : > { %604 = vmax.xlane.f32.xlu0 %v603_v28 }
 0x2ae   : > { %v595_v29 = vpop.f32.mrb[4].mxu1 }
 0x2af   : > { %v519_v30 = vpop.f32.mrb[2].mxu0  ;;  %v1395_v31 = vpop.f32.mrb[5].mxu1  ;;  %v609_v32 = vsel %vm599_vm3, %v595_v29, -inf }
 0x2b0   : > { %v1390_v33 = vpop.f32.mrb[3].mxu0  ;;  %610 = vmax.xlane.f32.xlu1 %v609_v32  ;;  %v606_v34 = vsel %vm599_vm3, %v519_v30, -inf }
 0x2b1   : > { %607 = vmax.xlane.f32.xlu0 %v606_v34 }
 0x2ca   : > { %v602_v35 = vpop.xlane.xlu1 %601 }
 0x2cb   : > { %v612_v36 = vsub.f32 %v367_v23, %v602_v35 }
 0x2cd   : > { %v616_v37 = vmul.f32 1.442695, %v612_v36 }
 0x2cf   : > { %1510 = vpow2.f32 %v616_v37 }
 0x2d9   : > { %v1511_v38 = vpop.eup %1510 }
 0x2da   : > { %v624_v39 = vsel %vm599_vm3, %v1511_v38, 0.0 }
 0x2db   : > { %625 = vadd.xlane.f32.xlu0 %v624_v39 }
 0x339   : > { %v605_v40 = vpop.xlane.xlu0 %604 }
 0x33a   : > { %v613_v41 = vsub.f32 %v443_v26, %v605_v40 }
 0x33c   : > { %v618_v42 = vmul.f32 1.442695, %v613_v41 }
 0x33d   : > { %v611_v50 = vpop.xlane.xlu1 %610 }
 0x33e   : > { %1512 = vpow2.f32 %v618_v42  ;;  %v608_v43 = vpop.xlane.xlu0 %607  ;;  %v615_v52 = vsub.f32 %v595_v29, %v611_v50 }
 0x33f   : > { %v614_v44 = vsub.f32 %v519_v30, %v608_v43 }
 0x340   : > { %v622_v53 = vmul.f32 1.442695, %v615_v52 }
 0x341   : > { %v620_v45 = vmul.f32 1.442695, %v614_v44 }
 0x343   : > { %1514 = vpow2.f32 %v620_v45 }
 0x348   : > { %v1513_v46 = vpop.eup %1512 }
 0x349   : > { %v627_v47 = vsel %vm599_vm3, %v1513_v46, 0.0 }
 0x34a   : > { %628 = vadd.xlane.f32.xlu1 %v627_v47 }
 0x34d   : > { %v1515_v48 = vpop.eup %1514 }
 0x34e   : > { %v630_v49 = vsel %vm599_vm3, %v1515_v48, 0.0 }
 0x34f   : > { %631 = vadd.xlane.f32.xlu0 %v630_v49 }
 0x35b   : > { %288 = vrot.lane.b32.xlu1 %v1710_v15, %s1595_s8  ;;  %s186_s8 = sand.u32 1, %s1580_s16  }
 0x35c   : > { %s1324_s9 = sshll.u32 %s186_s8, 3  ;;  %s1248_s27 = scalar_lea.sflag [#allocation3], %s186_s8 }
 0x35d   : > { %s188_s13 = scalar_lea.vmem [#allocation2], %s1324_s9 }
 0x35e   : > { %s1261_s14 = sshll.u32 %s188_s13, 4  ;;  %s1804_s14 = int_to_ptr.vmem [resolvable:$true] %s1261_s14 }
 0x35f   : > { %s1526_s28 = scalar_lea.vmem %s1804_s14, 128  ;;  %p1533_p0 = scmp.lt.s32.totalorder %s1804_s14, %s1531_s29 }
 0x360   : > { %p1527_p11 = scmp.ne.s32.totalorder %s1804_s14, %s1526_s28  ;;  %p1534_p1 = scmp.lt.s32.totalorder %s1532_s30, %s1526_s28 }
 0x362   : > { %p1528_p12 = pnand %p1527_p11, %p1661_p5  ;;  %p1535_p2 = por %p1534_p1, %p1533_p0 }
 0x364   : > { %p1529_p13 = pneg %p1528_p12 }
 0x365   : > { %285 = vrot.lane.b32.xlu0 %v1710_v15, %s1593_s6 }
 0x366   : > { %p1536_p3 = pnand %p1535_p2, %p1529_p13 }
 0x368   : > { %v626_v51 = vpop.xlane.xlu0 %625 }
 0x369   : > { %1516 = vrcp.f32 %v626_v51 }
 0x36a   : > { %1518 = vpow2.f32 %v622_v53 }
 0x373   : > { %v1517_v54 = vpop.eup %1516 }
 0x374   : > { %v640_v55 = vmul.f32 %v1517_v54, %v1511_v38  ;;  %v1519_v56 = vpop.eup %1518 }
 0x375   : > { %v633_v57 = vsel %vm599_vm3, %v1519_v56, 0.0 }
 0x376   : > { %1399 = vmatmul.mubr.msk.f32.vlgmr.msra.gmra.mrb[4].mxu0 %vm599_vm3, %v640_v55 }
 0x377   : > { %1408 = vmatprep.mubr.msk.f32.mxu0 %vm1591_vm1, %v1590_v7 }
 0x37f   : > { %634 = vadd.xlane.f32.xlu1 %v633_v57 }
 0x390   : > { %291 = vrot.lane.b32.xlu1 %v1710_v15, %s1592_s5  ;;  %v1164_v15 = vld [vmem:[%s1847_s2 + $0x38] sm:$0xff] }
 0x391   : > { %v1462_v16 = vpack.c.bf16 %v1164_v15, %v1163_v14 }
 0x3d7   : > { %v629_v58 = vpop.xlane.xlu1 %628 }
 0x3d8   : > { %1520 = vrcp.f32 %v629_v58 }
 0x3db   : > { %v289_v59 = vpop.permute.xlu1 %288 }
 0x3dc   : > { %v632_v60 = vpop.xlane.xlu0 %631  ;;  %1407 = vmatpush3.msra.mxu0 %v289_v59 }
 0x3dd   : > { %1522 = vrcp.f32 %v632_v60  ;;  %1452 = vmatprep.subr.bf16.mxu0 %v1596_v61 }
 0x3e0   : > { %v286_v62 = vpop.permute.xlu0 %285 }
 0x3e1   : > { %1402 = vmatpush3.msra.mxu1 %v286_v62 }
 0x3e2   : > { %v1521_v63 = vpop.eup %1520  ;;  %1411 = vmatprep.subr.mxu1 %v1590_v7 }
 0x3e3   : > { %v641_v0 = vmul.f32 %v1521_v63, %v1513_v46 }
 0x3e5   : > { %1404 = vmatmul.mubr.msk.f32.vlgmr.msra.gmra.mrb[6].mxu1 %vm599_vm3, %v641_v0 }
 0x3e6   : > { %1413 = vmatprep.mubr.msk.f32.mxu1 %vm1591_vm1, %v1590_v7 }
 0x3e7   : > { %v1523_v3 = vpop.eup %1522 }
 0x3e8   : > { %v642_v5 = vmul.f32 %v1523_v3, %v1515_v48 }
 0x3ea   : > { %1409 = vmatmul.mubr.msk.f32.vlgmr.msra.gmra.mrb[6].mxu0 %vm599_vm3, %v642_v5 }
 0x3eb   : > { %1454 = vmatpush3.bf16.msra.mxu0 %v1453_v4  ;;  %1420 = vmatprep.mubr.msk.f32.mxu0 %vm1591_vm1, %v1590_v7 }
 0x3ec   : > { %1458 = vmatprep.subr.bf16.mxu0 %v1596_v61 }
 0x40c   : > { %v635_v6 = vpop.xlane.xlu1 %634 }
 0x40d   : > { %1524 = vrcp.f32 %v635_v6 }
 0x410   : > { %v292_v8 = vpop.permute.xlu1 %291 }
 0x411   : > { %1412 = vmatpush3.msra.mxu1 %v292_v8 }
 0x412   : > { %1455 = vmatprep.subr.bf16.mxu1 %v1596_v61 }
 0x417   : > { %v1525_v11 = vpop.eup %1524 }
 0x418   : > { %v643_v13 = vmul.f32 %v1525_v11, %v1519_v56 }
 0x41a   : > { %1414 = vmatmul.mubr.msk.f32.vlgmr.msra.gmra.mrb[8].mxu1 %vm599_vm3, %v643_v13 }
 0x41b   : > { %1457 = vmatpush3.bf16.msra.mxu1 %v1456_v12  ;;  %1427 = vmatprep.mubr.msk.f32.mxu1 %vm1591_vm1, %v1590_v7 }
 0x41c   : > { %1461 = vmatprep.subr.bf16.mxu1 %v1596_v61 }
 0x449   : > { %v713_v17 = vpop.f32.mrb[4].mxu0 }
 0x44a   : > { %v1400_v18 = vpop.f32.mrb[5].mxu0  ;;  %1428 = vmatmul.mubr.msk.f32.vlgmr.msra.gmra.mrb[10].mxu1 %vm296_vm2, %v713_v17 }
 0x44b   : > { %1463 = vmatpush3.bf16.msra.mxu1 %v1462_v16  ;;  %1441 = vmatprep.mubr.msk.f32.mxu1 %vm1591_vm1, %v1590_v7 }
 0x4b8   : > { %v786_v22 = vpop.f32.mrb[6].mxu1 }
 0x4b9   : > { %v1405_v23 = vpop.f32.mrb[7].mxu1  ;;  %1421 = vmatmul.mubr.msk.f32.vlgmr.msra.gmra.mrb[8].mxu0 %vm296_vm2, %v786_v22 }
 0x4ba   : > { %1460 = vmatpush3.bf16.msra.mxu0 %v1459_v21  ;;  %1434 = vmatprep.mubr.msk.f32.mxu0 %vm1591_vm1, %v1590_v7  ;;  %v1343_v7 = vld [vmem:[%s1848_s3] ss:$0 sm:$0xff] }
 0x4bd   : > { %v859_v24 = vpop.f32.mrb[6].mxu0 }
 0x4be   : > { %v1410_v25 = vpop.f32.mrb[7].mxu0  ;;  %1435 = vmatmul.mubr.msk.f32.vlgmr.msra.gmra.mrb[10].mxu0 %vm296_vm2, %v859_v24 }
 0x4ed   : > { %v932_v26 = vpop.f32.mrb[8].mxu1 }
 0x4ee   : > { %v1415_v27 = vpop.f32.mrb[9].mxu1  ;;  %1442 = vmatmul.mubr.msk.f32.vlgmr.msra.gmra.mrb[12].mxu1 %vm296_vm2, %v932_v26 }
 0x51d   : > { %v1083_v28 = vpop.f32.mrb[10].mxu1 }
 0x51e   : > { %v1429_v29 = vpop.f32.mrb[11].mxu1 }
 0x58c   : > { %v1010_v30 = vpop.f32.mrb[8].mxu0 }
 0x58d   : > { %v1084_v31 = vadd.f32 %v1083_v28, %v1010_v30  ;;  %v1422_v32 = vpop.f32.mrb[9].mxu0 }
 0x591   : > { %v1158_v33 = vpop.f32.mrb[10].mxu0 }
 0x592   : > { %v1162_v34 = vadd.f32 %v1158_v33, %v1084_v31  ;;  %v1436_v35 = vpop.f32.mrb[11].mxu0 }
 0x5c1   : > { %v1234_v36 = vpop.f32.mrb[12].mxu1 }
 0x5c2   : > { %v1238_v37 = vadd.f32 %v1234_v36, %v1162_v34  ;;  %v1443_v38 = vpop.f32.mrb[13].mxu1 }
 0x5c4   : > { %v1245_v39 = vadd.f32 %v1343_v7, %v1238_v37 }
 0x5c6   : > { %1246 = vst.msk [vmem:[%s188_s13] sm:$0xff] %vm202_vm0, %v1245_v39 }
 0x5c7   : > { %1539 = shalt.err (!%p1536_p3)
}
 0x5c8   : > { %s1540_s5 = scalar_lea.hbm %s1802_s23, 128  ;;  %s1544_s8 = scalar_lea.hbm %s1849_s4, 256 }
 0x5c9   : > { %p1541_p4 = scmp.ne.s32.totalorder %s1802_s23, %s1540_s5  ;;  %p1545_p9 = scmp.lt.u32.totalorder %s1802_s23, %s1849_s4 }
 0x5ca   : > { %p1546_p10 = scmp.lt.u32.totalorder %s1544_s8, %s1540_s5  ;;  %p1548_p12 = scmp.lt.u32.totalorder %s1540_s5, %s1802_s23 }
 0x5cb   : > { %p1542_p7 = pnand %p1541_p4, %p1661_p5 }
 0x5cc   : > { %p1547_p11 = por %p1546_p10, %p1545_p9 }
 0x5cd   : > { %p1543_p8 = pneg %p1542_p7 }
 0x5ce   : > { %p1549_p13 = por %p1548_p12, %p1547_p11 }
 0x5d0   : > { %p1550_p0 = pnand %p1549_p13, %p1543_p8 }
 0x5d2   : > { %1553 = shalt.err (!%p1550_p0)
}
 0x5d3   : > { %1464 = dma.vmem_to_hbm [thread:$0]  (%p1661_p5), %s1804_s14, 128, %s1802_s23, %s1248_s27  }
 0x5d4 PF: > { %p1470_p1 = scmp.ge.s32.totalorder %s1588_s18, 2  ;;  %s1273_s11 = sand.u32 1, %s1576_s15  }
 0x5d5   : > { %s1274_s12 = scalar_lea.sflag [#allocation3], %s1273_s11 }
 0x5d6   : > { %p1467_p2 = pnand %p1470_p1, %p1665_p6 }
 0x5d8   : > { %1571 = dma.done.wait (!%p1467_p2), %s1274_s12, 128  }
 0x5d9   : > { %1573 = vsyncadd (!%p1467_p2), %s1274_s12, 4294967168  ;;  %p14_p3 = scmp.ge.s32.totalorder %s1648_s21, 4   ;;  %s1852_s15 = smov %s1580_s16 }
 0x5da   : > { %s1853_s16 = smov %s1584_s17  ;;  %s1854_s17 = smov %s1659_s24 }
 0x5db   : > { %s1855_s18 = smov %s1648_s21  ;;  %16 = sbr.rel (!%p14_p3) target bundleno = 3 (0x3), region = 71 }
 0x5e2   :  { %1279 = vsyncpa [#allocation3], 1 }
 0x5e3   :  { %1281 = vsyncpa [#allocation3 + $0x1], 1 }

</bundles_post_ra>
